<compile_context>
chip_gen: v7x
topology: tpu7x:2x2x1
jax: 0.10.0
libtpu: 0.0.40
codegen_flags: <defaults>
</compile_context>

<pallas_src>
import jax
import jax.numpy as jnp
from jax.experimental import pallas as pl
from jax.experimental.pallas import tpu as pltpu

_MIB = 1024 * 1024


def _round_up(x, m):
    return ((x + m - 1) // m) * m


def _round_down(x, m):
    return (x // m) * m


def _mlp_kernel(x_ref, w1_ref, b1_ref, w2_ref, b2_ref, o_ref):
    """Feature-major fused MLP tile: o = w2 @ relu(w1 @ x + b1) + b2.

    Shapes (TB = batch tile on the lane axis):
      x_ref: (I, TB)  w1_ref: (H, I)  b1_ref: (H, 1)
      w2_ref: (O, H)  b2_ref: (O, 1)  o_ref:  (O, TB)
    """
    # Layer 1 on the MXU: M=H, K=I, N=TB (lane-dense).  f32 accumulate.
    h = jnp.dot(w1_ref[...], x_ref[...].astype(w1_ref.dtype),
                preferred_element_type=jnp.float32)
    # Bias + ReLU epilogue stays f32 on the VPU (v5e has no bf16 VALU).
    h = jnp.maximum(h + b1_ref[...], 0.0)
    # Layer 2 on the MXU: M=O, K=H, N=TB.
    y = jnp.dot(w2_ref[...], h.astype(w2_ref.dtype),
                preferred_element_type=jnp.float32)
    o_ref[...] = (y + b2_ref[...]).astype(o_ref.dtype)


def _pick_batch_tile(B, requested):
    """Lane-aligned batch tile; prefer an even grid-step count (v7x 2-TC balance)."""
    if B <= requested:
        return B
    tile = max(128, _round_down(min(requested, B), 128))
    if tile >= B:
        return B
    n_b = pl.cdiv(B, tile)
    if n_b > 1 and n_b % 2 == 1:
        cand = _round_up(pl.cdiv(B, n_b + 1), 128)
        if 128 <= cand < B and pl.cdiv(B, cand) % 2 == 0:
            tile = cand
    return tile


def _grid_vmem_estimate(tile, I, H, O, x_item, w_item):
    act = 2 * tile * (I * x_item + O * x_item)              # double-buffered x / out tiles
    wts = 2 * ((I * H + H * O) * w_item + (H + O) * 4)      # resident weights + biases (2 bufs)
    hid = tile * H * 4                                       # f32 hidden intermediate
    return act + wts + hid


def _vmem_limit(est_bytes):
    # Raise the scoped-VMEM limit when useful; stay under v7x's 64 MiB physical.
    return int(min(max(2 * est_bytes, 32 * _MIB), 64 * _MIB))


def simple_neural_network(x, w1, b1, w2, b2, *, batch_tile=2048,
                          matmul_dtype=None, feature_major_io=False):
    """Fused forward: relu(x @ w1.T + b1) @ w2.T + b2.

    Args:
      x:  (B, I) activations; (I, B) if feature_major_io=True.
      w1: (H, I) layer1.weight (PyTorch layout).
      b1: (H,)   layer1.bias.
      w2: (O, H) layer2.weight.
      b2: (O,)   layer2.bias.
      batch_tile: target rows per grid step for large batches.
      matmul_dtype: optional MXU operand dtype (e.g. jnp.bfloat16 at large I/H
        on v6e/v7x).  Weights are cast once here; accumulation stays f32.
        Loosen numerical tolerances vs an f32 reference when enabled.
      feature_major_io: if True, x is already (I, B) and the output is returned
        as (O, B) -- skips the wrapper-side layout transposes entirely.
    Returns:
      (B, O) output (or (O, B) if feature_major_io=True), dtype of x.
    """
    H, I = w1.shape
    O = w2.shape[0]
    assert w2.shape[1] == H and b1.size == H and b2.size == O

    if feature_major_io:
        assert x.shape[0] == I
        xT, B = x, x.shape[1]
    else:
        assert x.shape[1] == I
        B = x.shape[0]
        xT = x.T  # feature-major: batch lands on the 128-wide lane axis

    if matmul_dtype is not None:
        w1 = w1.astype(matmul_dtype)   # cast once in HBM, not per grid step
        w2 = w2.astype(matmul_dtype)

    b1c = b1.reshape(H, 1)
    b2c = b2.reshape(O, 1)
    out_dtype = x.dtype
    x_item = jnp.dtype(out_dtype).itemsize
    w_item = jnp.dtype(w1.dtype).itemsize

    # ---------- grid-less single-block fast path (small problems) ----------
    small_bytes = ((B * I + B * O + B * H) * max(x_item, 4)
                   + (I * H + H * O) * w_item + (H + O) * 4)
    if B <= batch_tile and small_bytes <= 8 * _MIB:
        yT = pl.pallas_call(
            _mlp_kernel,
            out_shape=jax.ShapeDtypeStruct((O, B), out_dtype),
            in_specs=[pl.BlockSpec(memory_space=pltpu.MemorySpace.VMEM)] * 5,
            out_specs=pl.BlockSpec(memory_space=pltpu.MemorySpace.VMEM),
            compiler_params=pltpu.CompilerParams(
                vmem_limit_bytes=_vmem_limit(small_bytes)),
        )(xT, w1, b1c, w2, b2c)
        return yT if feature_major_io else yT.T

    # ---------- batch-tiled grid path (resident weights, pipelined x/out) ----------
    tile = _pick_batch_tile(B, batch_tile)
    est = _grid_vmem_estimate(tile, I, H, O, x_item, w_item)
    # VMEM budget guard (v7x has only 64 MiB physical per TensorCore).
    while est > 48 * _MIB and tile >= 256 and tile % 128 == 0:
        tile //= 2
        est = _grid_vmem_estimate(tile, I, H, O, x_item, w_item)
    # TODO(synk): if the resident weights alone blow the v7x budget, add a third
    #             "arbitrary" grid axis tiling the I/H contraction dims (or force
    #             bf16 weights) instead of shrinking the batch tile further.
    n_b = pl.cdiv(B, tile)

    yT = pl.pallas_call(
        _mlp_kernel,
        out_shape=jax.ShapeDtypeStruct((O, B), out_dtype),
        grid=(n_b,),
        in_specs=[
            pl.BlockSpec((I, tile), lambda i: (0, i)),   # x tile: lane-dense batch
            pl.BlockSpec((H, I), lambda i: (0, 0)),      # resident weights/biases
            pl.BlockSpec((H, 1), lambda i: (0, 0)),      # (constant block index ->
            pl.BlockSpec((O, H), lambda i: (0, 0)),      #  fetched once, no re-DMA)
            pl.BlockSpec((O, 1), lambda i: (0, 0)),
            # TODO(synk): pipeline_mode=pl.Buffered(1) on the constant weight/bias
            #             blocks would halve their VMEM residency at scaled dims.
        ],
        out_specs=pl.BlockSpec((O, tile), lambda i: (0, i)),
        compiler_params=pltpu.CompilerParams(
            # Batch tiles are independent -> shard across TCs on v7x megacore.
            dimension_semantics=("parallel",),
            vmem_limit_bytes=_vmem_limit(est),
        ),
    )(xT, w1, b1c, w2, b2c)
    # Ragged last tile: out-of-bounds lanes are masked on write by Pallas; since
    # batch is never a contraction dim, garbage lanes never touch real outputs.
    return yT if feature_major_io else yT.T


if __name__ == "__main__":
    # Shapes consistent with SimpleNeuralNetwork(input_size, hidden_size, output_size)
    batch_size, input_size, hidden_size, output_size = 8, 16, 32, 8

    key = jax.random.PRNGKey(0)
    kx, kw1, kb1, kw2, kb2 = jax.random.split(key, 5)

    x = jax.random.normal(kx, (batch_size, input_size), dtype=jnp.float32)

    # Deterministic init mimicking nn.Linear's uniform(-1/sqrt(fan_in), 1/sqrt(fan_in)),
    # weights stored in native PyTorch layout: W1 (H, I), W2 (O, H).
    bound1 = 1.0 / (input_size ** 0.5)
    w1 = jax.random.uniform(kw1, (hidden_size, input_size), jnp.float32, -bound1, bound1)
    b1 = jax.random.uniform(kb1, (hidden_size,), jnp.float32, -bound1, bound1)
    bound2 = 1.0 / (hidden_size ** 0.5)
    w2 = jax.random.uniform(kw2, (output_size, hidden_size), jnp.float32, -bound2, bound2)
    b2 = jax.random.uniform(kb2, (output_size,), jnp.float32, -bound2, bound2)

    def ref_fn(xx):
        return jnp.maximum(xx @ w1.T + b1, 0.0) @ w2.T + b2

    # 1) Small batch: grid-less single-block path.
    out = jax.block_until_ready(simple_neural_network(x, w1, b1, w2, b2))
    assert out.shape == (batch_size, output_size)
    assert jnp.allclose(out, ref_fn(x), atol=1e-5, rtol=1e-5), "small-batch mismatch"

    # 2) Ragged batch-tiled grid path (partial last tile, no pad/slice copies).
    xb = jax.random.normal(jax.random.PRNGKey(1), (1050, input_size), dtype=jnp.float32)
    out_b = jax.block_until_ready(
        simple_neural_network(xb, w1, b1, w2, b2, batch_tile=256))
    assert out_b.shape == (1050, output_size)
    assert jnp.allclose(out_b, ref_fn(xb), atol=1e-5, rtol=1e-5), "tiled-batch mismatch"

    # 3) Large batch at the default tile; exercises the even-grid-split heuristic.
    xc = jax.random.normal(jax.random.PRNGKey(2), (4097, input_size), dtype=jnp.float32)
    out_c = jax.block_until_ready(simple_neural_network(xc, w1, b1, w2, b2))
    assert out_c.shape == (4097, output_size)
    assert jnp.allclose(out_c, ref_fn(xc), atol=1e-5, rtol=1e-5), "large-batch mismatch"

    print("KERNEL_OK")
</pallas_src>

<mosaic_0001>
module attributes {stable_mosaic.version = 11 : i64} {
  func.func @_mlp_kernel(%arg0: memref<16x8xf32, #tpu.memory_space<vmem>>, %arg1: memref<32x16xf32, #tpu.memory_space<vmem>>, %arg2: memref<32x1xf32, #tpu.memory_space<vmem>>, %arg3: memref<8x32xf32, #tpu.memory_space<vmem>>, %arg4: memref<8x1xf32, #tpu.memory_space<vmem>>, %arg5: memref<8x8xf32, #tpu.memory_space<vmem>>) attributes {dimension_semantics = [], scalar_prefetch = 0 : i64, scratch_operands = 0 : i64, tpu.core_type = #tpu.core_type<tc>} {
    %c0 = arith.constant 0 : index
    %c0_0 = arith.constant 0 : index
    %0 = vector.load %arg1[%c0, %c0_0] : memref<32x16xf32, #tpu.memory_space<vmem>>, vector<32x16xf32>
    %c0_1 = arith.constant 0 : index
    %c0_2 = arith.constant 0 : index
    %1 = vector.load %arg0[%c0_1, %c0_2] : memref<16x8xf32, #tpu.memory_space<vmem>>, vector<16x8xf32>
    %cst = arith.constant dense<0.000000e+00> : vector<32x8xf32>
    %2 = tpu.matmul %0, %1, %cst {dimension_numbers = #tpu.dot_dimension_numbers<[1], [0], [0], [1], [0, 0, 1, 1], [], []>} : vector<32x16xf32>, vector<16x8xf32>, vector<32x8xf32> -> vector<32x8xf32>
    %c0_3 = arith.constant 0 : index
    %c0_4 = arith.constant 0 : index
    %3 = vector.load %arg2[%c0_3, %c0_4] : memref<32x1xf32, #tpu.memory_space<vmem>>, vector<32x1xf32>
    %4 = vector.broadcast %3 : vector<32x1xf32> to vector<32x8xf32>
    %5 = arith.addf %2, %4 : vector<32x8xf32>
    %cst_5 = arith.constant 0.000000e+00 : f32
    %6 = vector.broadcast %cst_5 : f32 to vector<32x8xf32>
    %7 = arith.maximumf %5, %6 : vector<32x8xf32>
    %c0_6 = arith.constant 0 : index
    %c0_7 = arith.constant 0 : index
    %8 = vector.load %arg3[%c0_6, %c0_7] : memref<8x32xf32, #tpu.memory_space<vmem>>, vector<8x32xf32>
    %cst_8 = arith.constant dense<0.000000e+00> : vector<8x8xf32>
    %9 = tpu.matmul %8, %7, %cst_8 {dimension_numbers = #tpu.dot_dimension_numbers<[1], [0], [0], [1], [0, 0, 1, 1], [], []>} : vector<8x32xf32>, vector<32x8xf32>, vector<8x8xf32> -> vector<8x8xf32>
    %c0_9 = arith.constant 0 : index
    %c0_10 = arith.constant 0 : index
    %10 = vector.load %arg4[%c0_9, %c0_10] : memref<8x1xf32, #tpu.memory_space<vmem>>, vector<8x1xf32>
    %11 = vector.broadcast %10 : vector<8x1xf32> to vector<8x8xf32>
    %12 = arith.addf %9, %11 : vector<8x8xf32>
    %c0_11 = arith.constant 0 : index
    %c0_12 = arith.constant 0 : index
    %13 = vector.load %arg5[%c0_11, %c0_12] : memref<8x8xf32, #tpu.memory_space<vmem>>, vector<8x8xf32>
    tpu.vector_store %arg5[%c0_11, %c0_12], %12 {strides = array<i32>} : memref<8x8xf32, #tpu.memory_space<vmem>>, vector<8x8xf32>,
    return
  }
}

</mosaic_0001>

<bundles_post_ra>
// kernel: tpu_custom_call.1
= control target key start
LH: loop header
LB: loop body
LE: loop exit
PB: predicated region body
PF: predicated region fallthrough
CT: control target
= control target key end

     0   :  { %vm51_vm0 = vcmask 130048   ;;  %v328_v4 = vmov 0   ;;  %s415_s0 = inlined_call_operand.vmem [shape: f32[16,8], index: 0, kind: input, shape index: {}]   ;;  %s416_s1 = inlined_call_operand.vmem [shape: f32[32,16], index: 1, kind: input, shape index: {}]   ;;  %s417_s2 = inlined_call_operand.vmem [shape: f32[32,1], index: 2, kind: input, shape index: {}]   ;;  %s418_s3 = inlined_call_operand.vmem [shape: f32[8,32], index: 3, kind: input, shape index: {}]   ;;  %s419_s4 = inlined_call_operand.vmem [shape: f32[8,1], index: 4, kind: input, shape index: {}]   ;;  %s420_s5 = inlined_call_operand.hbm [shape: f32[8,8], index: 5, kind: output, shape index: {}]  }
   0x1   :  { %v25_v0 = vld [vmem:[%s415_s0] sm:$0xff]  ;;  %v26_v1 = vld [vmem:[%s415_s0 + $0x8] sm:$0xff]  ;;  %302 = vset.pattern.permute.xlu0 %v328_v4  ;;  %303 = vset.pattern.permute.xlu1 %v328_v4  ;;  %v29_v6 = vld [vmem:[%s417_s2 + $0x10] sm:$0xff] }
   0x2   :  { %v21_v2 = vld [vmem:[%s416_s1] sm:$0xff]  ;;  %v287_v3 = vpack.c.bf16 %v26_v1, %v25_v0 }
   0x3   :  { %270 = vmatprep.mubr.msk.f32.mxu0 %vm51_vm0, %v21_v2  ;;  %v27_v5 = vld [vmem:[%s417_s2] sm:$0xff] }
   0x4   :  { %288 = vmatprep.subr.bf16.mxu0 %v287_v3  ;;  %33 = vperm.xlu0 %302, %v27_v5  }
   0x5   :  { %10 = vsyncpa [#allocation3], 0  ;;  %290 = vmatpush3.bf16.msra.mxu0 %v287_v3  ;;  %v22_v7 = vld [vmem:[%s416_s1 + $0x8] sm:$0xff]  ;;  %43 = vperm.xlu1 %303, %v29_v6   ;;  %v23_v9 = vld [vmem:[%s416_s1 + $0x10] sm:$0xff]  ;;  %v329_v13 = vmov 0.0|0.0   ;;  %vm330_vm1 = vmmov 0  }
   0x6   :  { %v28_v8 = vld [vmem:[%s417_s2 + $0x8] sm:$0xff]  ;;  %v30_v10 = vld [vmem:[%s417_s2 + $0x18] sm:$0xff]  ;;  %v154_v12 = vld [vmem:[%s419_s4] sm:$0xff]  ;;  %291 = vmatprep.subr.bf16.mxu1 %v329_v13  ;;  %v331_v14 = vmov 0.0   ;;  %vm160_vm2 = vcmask 261120   ;;  %s332_s4 = smov [#allocation2]  }
   0x7   :  { %v24_v11 = vld [vmem:[%s416_s1 + $0x18] sm:$0xff]  ;;  %284 = vmatprep.mubr.msk.f32.mxu1 %vm330_vm1, %v331_v14  ;;  %v153_v33 = vld [vmem:[%s418_s3] sm:$0xff]  ;;  %s242_s14 = sshll.u32 %s332_s4, 4  ;;  %vm234_vm3 = vcmask 64512   ;;  %s243_s14 = int_to_ptr.vmem [resolvable:$true] %s242_s14 }
   0x8   :  { %271 = vmatmul.mubr.msk.f32.vlgmr.msra.gmra.mrb[0].mxu0 %vm51_vm0, %v22_v7  ;;  %38 = vperm.xlu0 %302, %v28_v8   ;;  %s304_s15 = scalar_lea.vmem %s243_s14, 128  ;;  %p309_p1 = scmp.lt.s32.totalorder %s243_s14, %s243_s14 }
   0x9   :  { %273 = vmatprep.mubr.msk.f32.mxu0 %vm51_vm0, %v23_v9  ;;  %48 = vperm.xlu1 %303, %v30_v10   ;;  %p305_p0 = scmp.ne.s32.totalorder %s243_s14, %s304_s15  ;;  %p310_p2 = scmp.lt.s32.totalorder %s304_s15, %s304_s15 }
   0xb   :  { %p311_p3 = por %p310_p2, %p309_p1 }
   0xc   :  { %274 = vmatmul.mubr.msk.f32.gmra.mrb[2].mxu0 %vm51_vm0, %v24_v11  ;;  %157 = vperm.xlu0 %302, %v154_v12  }
   0xd   :  { %p312_p4 = pnand %p311_p3, %p305_p0 }
  0x83   :  { %v34_v15 = vpop.permute.xlu0 %33 }
  0x84   :  { %v44_v16 = vpop.permute.xlu1 %43 }
  0x87   :  { %v39_v17 = vpop.permute.xlu0 %38 }
  0x88   :  { %v49_v23 = vpop.permute.xlu1 %48 }
  0x8b   :  { %v158_v34 = vpop.permute.xlu0 %157 }
  0xdb   :  { %v272_v18 = vpop.f32.mrb[0].mxu0 }
  0xdc   :  { %v136_v19 = vadd.f32 %v272_v18, %v39_v17  ;;  %v130_v20 = vpop.f32.mrb[1].mxu0 }
  0xdd   :  { %v131_v21 = vadd.f32 %v130_v20, %v34_v15 }
  0xde   :  { %v150_v22 = vmax.f32 %v136_v19, 0.0 }
  0xdf   :  { %v149_v24 = vmax.f32 %v131_v21, 0.0  ;;  %v275_v25 = vpop.f32.mrb[2].mxu0 }
  0xe0   :  { %v146_v26 = vadd.f32 %v275_v25, %v49_v23  ;;  %v140_v27 = vpop.f32.mrb[3].mxu0 }
  0xe1   :  { %v141_v28 = vadd.f32 %v140_v27, %v44_v16  ;;  %v292_v29 = vpack.c.bf16 %v150_v22, %v149_v24 }
  0xe2   :  { %v152_v30 = vmax.f32 %v146_v26, 0.0 }
  0xe3   :  { %v151_v31 = vmax.f32 %v141_v28, 0.0  ;;  %293 = vmatpush3.bf16.msra.mxu1 %v292_v29 }
  0xe4   :  { %294 = vmatprep.subr.bf16.mxu1 %v329_v13 }
  0xe5   :  { %v295_v32 = vpack.c.bf16 %v152_v30, %v151_v31 }
  0xe7   :  { %296 = vmatpush3.bf16.msra.mxu1 %v295_v32 }
  0xea   :  { %285 = vmatmul.mubr.msk.f32.vlgmr.msra.gmra.mrb[0].mxu1 %vm160_vm2, %v153_v33 }
 0x1bd   :  { %v230_v35 = vpop.f32.mrb[0].mxu1 }
 0x1be   :  { %v231_v36 = vadd.f32 %v230_v35, %v158_v34  ;;  %v286_v37 = vpop.f32.mrb[1].mxu1 }
 0x1c0   :  { %235 = vst.msk [vmem:[#allocation2] sm:$0xff] %vm234_vm3, %v231_v36 }
 0x1c1   :  { %315 = shalt.err (!%p312_p4)
}
 0x1c2   :  { %s316_s17 = scalar_lea.hbm %s420_s5, 128 }
 0x1c3   :  { %p317_p5 = scmp.ne.s32.totalorder %s420_s5, %s316_s17  ;;  %p320_p6 = scmp.lt.u32.totalorder %s316_s17, %s420_s5 }
 0x1c5   :  { %p322_p7 = pnand %p320_p6, %p317_p5 }
 0x1c7   :  { %325 = shalt.err (!%p322_p7)
}
 0x1c8   :  { %245 = dma.vmem_to_hbm [thread:$0]  %s243_s14, 128, %s420_s5, [#allocation3]  }
 0x1c9   :  { %326 = dma.done.wait [#allocation3], 128  }
 0x1ca   :  { %327 = vsyncadd [#allocation3], 4294967168 }
 0x1cb   :  { %249 = vsyncpa [#allocation3], 1 }

</bundles_post_ra>
